<compile_context>
chip_gen: v7x
topology: tpu7x:2x2x1
jax: 0.10.0
libtpu: 0.0.40
codegen_flags: <defaults>
</compile_context>

<pallas_src>
import jax
import jax.numpy as jnp
from jax.experimental import pallas as pl
from jax.experimental.pallas import tpu as pltpu

NUM_BRANCHES = 3


def concat_table_kernel(x_ref, wb_ref, o_ref):
    """Whole problem in one invocation: o[n] = W_sum^T @ x[n] + b_sum (VPU only).

    x_ref  : (N, Cin, HW)      input, channels on sublane, spatial on lane
    wb_ref : (Cout, Cin + 1)   summed 1x1-conv weight (transposed) with the summed bias
                               fused in as the last column
    o_ref  : (N, Cout, HW)     output (lane-dense: HW is a multiple of 128)
    """
    n, cin, hw = x_ref.shape
    cout = wb_ref.shape[0]

    x = x_ref[...]                    # (N, Cin, HW)
    wb = wb_ref[...]                  # (Cout, Cin+1)

    # Accumulator initialized directly from the broadcast (fused) bias column.
    acc = jnp.broadcast_to(wb[:, cin:cin + 1], (n, cout, hw))
    # K = Cin = 4: static unrolled VPU contraction, broadcast-multiply-add per channel.
    # (Cout,1) * (N,1,HW) -> (N,Cout,HW)
    for c in range(cin):
        acc = acc + wb[:, c:c + 1] * x[:, c:c + 1, :]

    o_ref[...] = acc


@jax.jit
def concat_table_forward(x_nchw, weights, biases):
    """ConcatTable of NUM_BRANCHES 1x1 convs, summed.

    x_nchw  : (N, Cin, H, W)   float32
    weights : (NB, Cin, Cout)  float32   (Conv2d weight [Cout, Cin, 1, 1] transposed/squeezed)
    biases  : (NB, 1, Cout)    float32
    returns : (N, Cout, H, W)  float32
    """
    n, cin, h, w = x_nchw.shape
    nb, cin_w, cout = weights.shape
    assert cin == cin_w and nb == NUM_BRANCHES
    hw = h * w
    # Block shapes below equal the full array extents; the lane axis (HW) must stay a
    # multiple of 128 (or full-extent) if shapes ever change.
    assert hw % 128 == 0, "HW (lane axis) must be a multiple of 128"

    # Algebraic branch folding + bias fusion (tiny tensors; negligible wrapper cost).
    w_sum_t = jnp.sum(weights, axis=0).T                      # (Cout, Cin)
    b_sum = jnp.sum(biases, axis=0).reshape(cout, 1)          # (Cout, 1)
    wb = jnp.concatenate([w_sum_t, b_sum], axis=1)            # (Cout, Cin+1)

    # Free reshape: channels stay contiguous as sublanes, spatial becomes the lane axis.
    x_rows = x_nchw.reshape(n, cin, hw)

    out = pl.pallas_call(
        concat_table_kernel,
        out_shape=jax.ShapeDtypeStruct((n, cout, hw), x_nchw.dtype),
        in_specs=[
            pl.BlockSpec((n, cin, hw), lambda: (0, 0, 0)),
            pl.BlockSpec((cout, cin + 1), lambda: (0, 0)),
        ],
        out_specs=pl.BlockSpec((n, cout, hw), lambda: (0, 0, 0)),
    )(x_rows, wb)

    # Free reshape back to NCHW (no transpose needed in this orientation).
    return out.reshape(n, cout, h, w)


def _reference(x_nchw, weights, biases):
    """Pure-JAX reference: sum over branches of 1x1 conv (NCHW), branch-by-branch."""
    n, cin, h, w = x_nchw.shape
    x_rows = jnp.transpose(x_nchw, (0, 2, 3, 1)).reshape(n * h * w, cin)
    out = None
    for nb in range(weights.shape[0]):
        o = x_rows @ weights[nb] + biases[nb]
        out = o if out is None else out + o
    cout = weights.shape[-1]
    return jnp.transpose(out.reshape(n, h, w, cout), (0, 3, 1, 2))


if __name__ == "__main__":
    key = jax.random.PRNGKey(0)
    k_x, k_w, k_b = jax.random.split(key, 3)

    N, CIN, H, W = 2, 4, 16, 16
    COUT = 8

    x = jax.random.normal(k_x, (N, CIN, H, W), dtype=jnp.float32)
    # PyTorch Conv2d weight shape is (Cout, Cin, 1, 1); stored pre-transposed as (NB, Cin, Cout).
    weights = jax.random.normal(k_w, (NUM_BRANCHES, CIN, COUT), dtype=jnp.float32) * 0.1
    biases = jax.random.normal(k_b, (NUM_BRANCHES, 1, COUT), dtype=jnp.float32) * 0.1

    out = concat_table_forward(x, weights, biases)
    out = jax.block_until_ready(out)

    ref = _reference(x, weights, biases)
    assert out.shape == (N, COUT, H, W)
    # Branch folding changes FP summation order vs. the per-branch reference -> tolerance assert.
    assert jnp.allclose(out, ref, atol=1e-5, rtol=1e-5), "mismatch vs reference"

    print("KERNEL_OK")
</pallas_src>

<mosaic_0001>
module attributes {stable_mosaic.version = 11 : i64} {
  func.func @concat_table_kernel(%arg0: memref<2x4x256xf32, #tpu.memory_space<vmem>>, %arg1: memref<8x5xf32, #tpu.memory_space<vmem>>, %arg2: memref<2x8x256xf32, #tpu.memory_space<vmem>>) attributes {dimension_semantics = [], scalar_prefetch = 0 : i64, scratch_operands = 0 : i64, tpu.core_type = #tpu.core_type<tc>} {
    %c0 = arith.constant 0 : index
    %c0_0 = arith.constant 0 : index
    %c0_1 = arith.constant 0 : index
    %0 = vector.load %arg0[%c0, %c0_0, %c0_1] : memref<2x4x256xf32, #tpu.memory_space<vmem>>, vector<2x4x256xf32>
    %c0_2 = arith.constant 0 : index
    %c0_3 = arith.constant 0 : index
    %1 = vector.load %arg1[%c0_2, %c0_3] : memref<8x5xf32, #tpu.memory_space<vmem>>, vector<8x5xf32>
    %2 = vector.extract_strided_slice %1 {offsets = [0, 4], sizes = [8, 1], strides = [1, 1]} : vector<8x5xf32> to vector<8x1xf32>
    %3 = vector.shape_cast %2 : vector<8x1xf32> to vector<1x8x1xf32>
    %4 = vector.broadcast %3 : vector<1x8x1xf32> to vector<2x8x256xf32>
    %5 = vector.extract_strided_slice %1 {offsets = [0, 0], sizes = [8, 1], strides = [1, 1]} : vector<8x5xf32> to vector<8x1xf32>
    %6 = vector.extract_strided_slice %0 {offsets = [0, 0, 0], sizes = [2, 1, 256], strides = [1, 1, 1]} : vector<2x4x256xf32> to vector<2x1x256xf32>
    %7 = vector.shape_cast %5 : vector<8x1xf32> to vector<1x8x1xf32>
    %8 = vector.broadcast %7 : vector<1x8x1xf32> to vector<2x8x256xf32>
    %9 = vector.broadcast %6 : vector<2x1x256xf32> to vector<2x8x256xf32>
    %10 = arith.mulf %8, %9 : vector<2x8x256xf32>
    %11 = arith.addf %4, %10 : vector<2x8x256xf32>
    %12 = vector.extract_strided_slice %1 {offsets = [0, 1], sizes = [8, 1], strides = [1, 1]} : vector<8x5xf32> to vector<8x1xf32>
    %13 = vector.extract_strided_slice %0 {offsets = [0, 1, 0], sizes = [2, 1, 256], strides = [1, 1, 1]} : vector<2x4x256xf32> to vector<2x1x256xf32>
    %14 = vector.shape_cast %12 : vector<8x1xf32> to vector<1x8x1xf32>
    %15 = vector.broadcast %14 : vector<1x8x1xf32> to vector<2x8x256xf32>
    %16 = vector.broadcast %13 : vector<2x1x256xf32> to vector<2x8x256xf32>
    %17 = arith.mulf %15, %16 : vector<2x8x256xf32>
    %18 = arith.addf %11, %17 : vector<2x8x256xf32>
    %19 = vector.extract_strided_slice %1 {offsets = [0, 2], sizes = [8, 1], strides = [1, 1]} : vector<8x5xf32> to vector<8x1xf32>
    %20 = vector.extract_strided_slice %0 {offsets = [0, 2, 0], sizes = [2, 1, 256], strides = [1, 1, 1]} : vector<2x4x256xf32> to vector<2x1x256xf32>
    %21 = vector.shape_cast %19 : vector<8x1xf32> to vector<1x8x1xf32>
    %22 = vector.broadcast %21 : vector<1x8x1xf32> to vector<2x8x256xf32>
    %23 = vector.broadcast %20 : vector<2x1x256xf32> to vector<2x8x256xf32>
    %24 = arith.mulf %22, %23 : vector<2x8x256xf32>
    %25 = arith.addf %18, %24 : vector<2x8x256xf32>
    %26 = vector.extract_strided_slice %1 {offsets = [0, 3], sizes = [8, 1], strides = [1, 1]} : vector<8x5xf32> to vector<8x1xf32>
    %27 = vector.extract_strided_slice %0 {offsets = [0, 3, 0], sizes = [2, 1, 256], strides = [1, 1, 1]} : vector<2x4x256xf32> to vector<2x1x256xf32>
    %28 = vector.shape_cast %26 : vector<8x1xf32> to vector<1x8x1xf32>
    %29 = vector.broadcast %28 : vector<1x8x1xf32> to vector<2x8x256xf32>
    %30 = vector.broadcast %27 : vector<2x1x256xf32> to vector<2x8x256xf32>
    %31 = arith.mulf %29, %30 : vector<2x8x256xf32>
    %32 = arith.addf %25, %31 : vector<2x8x256xf32>
    %c0_4 = arith.constant 0 : index
    %c0_5 = arith.constant 0 : index
    %c0_6 = arith.constant 0 : index
    %33 = vector.load %arg2[%c0_4, %c0_5, %c0_6] : memref<2x8x256xf32, #tpu.memory_space<vmem>>, vector<2x8x256xf32>
    tpu.vector_store %arg2[%c0_4, %c0_5, %c0_6], %32 {strides = array<i32>} : memref<2x8x256xf32, #tpu.memory_space<vmem>>, vector<2x8x256xf32>,
    return
  }
}

</mosaic_0001>

<bundles_post_ra>
// kernel: concat_table_forward.1
= control target key start
LH: loop header
LB: loop body
LE: loop exit
PB: predicated region body
PF: predicated region fallthrough
CT: control target
= control target key end

     0   :  { %v232_v0 = vmov 1   ;;  %v233_v1 = vmov 0   ;;  %v234_v3 = vmov 2   ;;  %v235_v4 = vmov 4   ;;  %s281_s1 = inlined_call_operand.vmem [shape: f32[8,5], index: 1, kind: input, shape index: {}]   ;;  %s282_s0 = inlined_call_operand.vmem [shape: f32[2,4,256], index: 0, kind: input, shape index: {}]   ;;  %s283_s2 = inlined_call_operand.vmem [shape: f32[2,8,256], index: 2, kind: output, shape index: {}]  }
   0x1   :  { %228 = vset.pattern.permute.xlu1 %v232_v0  ;;  %226 = vset.pattern.permute.xlu0 %v233_v1  ;;  %v13_v2 = vld [vmem:[%s281_s1] sm:$0xff]  ;;  %v236_v5 = vmov 3   ;;  %v25_v6 = vlaneseq  ;;  %v12_v13 = vld [vmem:[%s282_s0 + $0x8] sm:$0xff] }
   0x2   :  { %70 = vperm.xlu1 %228, %v13_v2   ;;  %20 = vperm.xlu0 %226, %v13_v2   ;;  %v11_v12 = vld [vmem:[%s282_s0] sm:$0xff] }
   0x3   :  { %v26_v7 = vshrl.u32 %v25_v6, 7 }
   0x5   :  { %v27_v8 = vsub.s32 0, %v26_v7  ;;  %v31_v9 = vsub.s32 4, %v26_v7  ;;  %v75_v10 = vsub.s32 1, %v26_v7  ;;  %v79_v11 = vsub.s32 5, %v26_v7 }
   0x6   :  { %229 = vset.pattern.permute.xlu1 %v234_v3  ;;  %227 = vset.pattern.permute.xlu0 %v235_v4  ;;  %v123_v14 = vsub.s32 2, %v26_v7  ;;  %v127_v15 = vsub.s32 6, %v26_v7  ;;  %v261_v16 = vsub.s32 3, %v26_v7  ;;  %v175_v17 = vsub.s32 7, %v26_v7 }
   0x7   :  { %118 = vperm.xlu1 %229, %v13_v2   ;;  %16 = vperm.xlu0 %227, %v13_v2   ;;  %v28_v18 = vrot.slane %v11_v12, %v27_v8  ;;  %v32_v19 = vrot.slane %v11_v12, %v31_v9  ;;  %v36_v20 = vrot.slane %v12_v13, %v27_v8 }
   0x8   :  { %v40_v21 = vrot.slane %v12_v13, %v31_v9  ;;  %v76_v22 = vrot.slane %v11_v12, %v75_v10  ;;  %v80_v23 = vrot.slane %v11_v12, %v79_v11  ;;  %v84_v24 = vrot.slane %v12_v13, %v75_v10 }
   0x9   :  { %v88_v25 = vrot.slane %v12_v13, %v79_v11  ;;  %v124_v26 = vrot.slane %v11_v12, %v123_v14  ;;  %v128_v27 = vrot.slane %v11_v12, %v127_v15  ;;  %v132_v28 = vrot.slane %v12_v13, %v123_v14 }
   0xa   :  { %v136_v29 = vrot.slane %v12_v13, %v127_v15  ;;  %v172_v32 = vrot.slane %v11_v12, %v261_v16  ;;  %v176_v33 = vrot.slane %v11_v12, %v175_v17  ;;  %v180_v34 = vrot.slane %v12_v13, %v261_v16 }
   0xb   :  { %230 = vset.pattern.permute.xlu1 %v236_v5  ;;  %231 = vset.pattern.permute.xlu0 %v236_v5  ;;  %v184_v35 = vrot.slane %v12_v13, %v175_v17  ;;  %v48_v36 = vrot.slane %v28_v18, %v27_v8  ;;  %v52_v37 = vrot.slane %v32_v19, %v27_v8 }
   0xc   :  { %166 = vperm.xlu1 %230, %v13_v2   ;;  %v56_v38 = vrot.slane %v36_v20, %v27_v8  ;;  %v60_v39 = vrot.slane %v40_v21, %v27_v8  ;;  %v96_v40 = vrot.slane %v76_v22, %v75_v10  ;;  %v100_v41 = vrot.slane %v80_v23, %v75_v10 }
   0xd   :  { %v104_v42 = vrot.slane %v84_v24, %v75_v10  ;;  %v108_v43 = vrot.slane %v88_v25, %v75_v10  ;;  %v144_v44 = vrot.slane %v124_v26, %v123_v14  ;;  %v148_v45 = vrot.slane %v128_v27, %v123_v14 }
   0xe   :  { %v152_v46 = vrot.slane %v132_v28, %v123_v14  ;;  %v156_v47 = vrot.slane %v136_v29, %v123_v14  ;;  %v192_v48 = vrot.slane %v172_v32, %v261_v16  ;;  %v196_v49 = vrot.slane %v176_v33, %v261_v16 }
   0xf   :  { %v200_v50 = vrot.slane %v180_v34, %v261_v16  ;;  %v204_v51 = vrot.slane %v184_v35, %v261_v16 }
  0x81   :  { %v71_v30 = vpop.permute.xlu1 %70  ;;  %v21_v31 = vpop.permute.xlu0 %20 }
  0x82   :  { %v61_v54 = vmul.f32 %v48_v36, %v21_v31  ;;  %v62_v55 = vmul.f32 %v52_v37, %v21_v31  ;;  %v63_v56 = vmul.f32 %v56_v38, %v21_v31  ;;  %v64_v57 = vmul.f32 %v60_v39, %v21_v31 }
  0x83   :  { %v109_v58 = vmul.f32 %v96_v40, %v71_v30  ;;  %v110_v59 = vmul.f32 %v100_v41, %v71_v30  ;;  %v111_v60 = vmul.f32 %v104_v42, %v71_v30  ;;  %v112_v61 = vmul.f32 %v108_v43, %v71_v30 }
  0x86   :  { %v119_v52 = vpop.permute.xlu1 %118  ;;  %v17_v53 = vpop.permute.xlu0 %16 }
  0x87   :  { %v65_v62 = vadd.f32 %v61_v54, %v17_v53  ;;  %v66_v63 = vadd.f32 %v62_v55, %v17_v53  ;;  %v67_v0 = vadd.f32 %v63_v56, %v17_v53  ;;  %v68_v1 = vadd.f32 %v64_v57, %v17_v53 }
  0x88   :  { %v157_v2 = vmul.f32 %v144_v44, %v119_v52  ;;  %v158_v3 = vmul.f32 %v148_v45, %v119_v52  ;;  %v159_v4 = vmul.f32 %v152_v46, %v119_v52  ;;  %v160_v5 = vmul.f32 %v156_v47, %v119_v52 }
  0x89   :  { %v113_v6 = vadd.f32 %v109_v58, %v65_v62  ;;  %v114_v7 = vadd.f32 %v110_v59, %v66_v63  ;;  %v115_v8 = vadd.f32 %v111_v60, %v67_v0  ;;  %v116_v9 = vadd.f32 %v112_v61, %v68_v1 }
  0x8b   :  { %v167_v10 = vpop.permute.xlu1 %166  ;;  %v161_v11 = vadd.f32 %v157_v2, %v113_v6  ;;  %v162_v12 = vadd.f32 %v158_v3, %v114_v7  ;;  %v163_v13 = vadd.f32 %v159_v4, %v115_v8  ;;  %v164_v14 = vadd.f32 %v160_v5, %v116_v9 }
  0x8c   :  { %v205_v15 = vmul.f32 %v192_v48, %v167_v10  ;;  %v206_v16 = vmul.f32 %v196_v49, %v167_v10  ;;  %v207_v17 = vmul.f32 %v200_v50, %v167_v10  ;;  %v208_v18 = vmul.f32 %v204_v51, %v167_v10 }
  0x8e   :  { %v209_v19 = vadd.f32 %v205_v15, %v161_v11  ;;  %v210_v20 = vadd.f32 %v206_v16, %v162_v12  ;;  %v211_v21 = vadd.f32 %v207_v17, %v163_v13  ;;  %v212_v22 = vadd.f32 %v208_v18, %v164_v14 }
  0x90   :  { %213 = vst [vmem:[%s283_s2] sm:$0xff] %v209_v19  ;;  %214 = vst [vmem:[%s283_s2 + $0x8] sm:$0xff] %v210_v20 }
  0x91   :  { %215 = vst [vmem:[%s283_s2 + $0x10] sm:$0xff] %v211_v21  ;;  %216 = vst [vmem:[%s283_s2 + $0x18] sm:$0xff] %v212_v22 }

</bundles_post_ra>
